<compile_context>
chip_gen: v7x
topology: tpu7x:2x2x1
jax: 0.10.0
libtpu: 0.0.40
codegen_flags: <defaults>
</compile_context>

<pallas_src>
import functools

import jax
import jax.numpy as jnp
from jax.experimental import pallas as pl
from jax.experimental.pallas import tpu as pltpu


# --------------------------------------------------------------------------- #
# Kernel
# --------------------------------------------------------------------------- #
def _downsample_kernel(xs_ref, xp_ref, w_ref, b_ref, o_ref, *acc,
                       cin, sliced, row_axis):
    """One grid step: one (image, output-row block, Cout tile).

    xs_ref : (tr, Wo, 4*Cin)  bf16  space-to-depth rows of this output block
    xp_ref : (1,  Wo, 4*Cin)  bf16  s2d row just above the block (seam halo)
    w_ref  : sliced -> (9*Cin, TCo) bf16 packed nonzero-K weights
             dense  -> (4, 4*Cin, TCo) bf16 per-shift weights (zero-padded K)
    b_ref  : (1, TCo) f32 bias (Cout-padded)
    o_ref  : (tr, Wo, TCo) output tile
    acc    : optional (tr, Wo, TCo) f32 scratch (only when o_ref is not f32)
    """
    tr, wo, k4 = xs_ref.shape
    tco = o_ref.shape[-1]
    out = acc[0] if acc else o_ref           # f32 accumulation target
    r = pl.program_id(row_axis)
    c = cin

    xs = xs_ref[...].reshape(tr * wo, k4)    # free view when Wo % 8 == 0

    def mm(lhs, rhs):
        return jnp.dot(lhs, rhs, preferred_element_type=jnp.float32)

    if sliced:
        # Contract only the 9*Cin nonzero K rows (vs 16*Cin dense).
        y0 = mm(xs, w_ref[0 * c:4 * c])                               # center
        y1 = (mm(xs[:, 1 * c:2 * c], w_ref[4 * c:5 * c]) +            # left (dh=0,dw=1)
              mm(xs[:, 3 * c:4 * c], w_ref[5 * c:6 * c]))             # left (dh=1,dw=1)
        y2 = mm(xs[:, 2 * c:4 * c], w_ref[6 * c:8 * c])               # up
        y3 = mm(xs[:, 3 * c:4 * c], w_ref[8 * c:9 * c])               # up-left
    else:
        y0 = mm(xs, w_ref[0])
        y1 = mm(xs, w_ref[1])
        y2 = mm(xs, w_ref[2])
        y3 = mm(xs, w_ref[3])

    y0 = y0.reshape(tr, wo, tco)
    y1 = y1.reshape(tr, wo, tco)
    y2 = y2.reshape(tr, wo, tco)
    y3 = y3.reshape(tr, wo, tco)

    # Tap t shifts its contribution by (dr, dc) in the output.  Contributions
    # that fall off the image edge are exactly the ones a zero-padded conv
    # would take from the zero border, so dropping them is correct.
    out[...] = y0 + b_ref[...]
    if wo > 1:
        out[:, 1:, :] += y1[:, :wo - 1, :]
    if tr > 1:
        out[1:, :, :] += y2[:tr - 1, :, :]
        if wo > 1:
            out[1:, 1:, :] += y3[:tr - 1, :wo - 1, :]

    # Seam: the row-shifted taps of the last s2d row of the *previous* row
    # block land on the first output row of this block (when r == 0 that row
    # is the conv's zero padding, so nothing is added).
    @pl.when(r > 0)
    def _seam():
        xp = xp_ref[...].reshape(wo, k4)
        if sliced:
            s2 = mm(xp[:, 2 * c:4 * c], w_ref[6 * c:8 * c])
            s3 = mm(xp[:, 3 * c:4 * c], w_ref[8 * c:9 * c])
        else:
            s2 = mm(xp, w_ref[2])
            s3 = mm(xp, w_ref[3])
        out[0:1, :, :] += s2
        if wo > 1:
            out[0:1, 1:, :] += s3[:wo - 1, :]

    if acc:
        o_ref[...] = out[...].astype(o_ref.dtype)


# --------------------------------------------------------------------------- #
# Weight packing (space-to-depth group order g = 2*dh + dw along K)
# --------------------------------------------------------------------------- #
def _build_weights_dense(weight_oihw, cout_pad):
    """OIHW (Cout, Cin, 3, 3) -> (4, 4*Cin, cout_pad) per-output-shift weights
    (zero K rows for the groups a shift does not touch)."""
    o, c, _, _ = weight_oihw.shape
    w = weight_oihw
    wt = jnp.zeros((4, 2, 2, c, o), dtype=w.dtype)
    # shift (0,0): kernel taps (kh,kw) in {1,2}x{1,2}
    wt = wt.at[0].set(jnp.transpose(w[:, :, 1:3, 1:3], (2, 3, 1, 0)))
    # shift (0,1): kernel col 0, rows {1,2}    (needs dw == 1)
    wt = wt.at[1, :, 1].set(jnp.transpose(w[:, :, 1:3, 0], (2, 1, 0)))
    # shift (1,0): kernel row 0, cols {1,2}    (needs dh == 1)
    wt = wt.at[2, 1].set(jnp.transpose(w[:, :, 0, 1:3], (2, 1, 0)))
    # shift (1,1): kernel tap (0,0)            (needs dh == dw == 1)
    wt = wt.at[3, 1, 1].set(jnp.transpose(w[:, :, 0, 0], (1, 0)))
    wt = wt.reshape(4, 4 * c, o)
    return jnp.pad(wt, ((0, 0), (0, 0), (0, cout_pad - o)))


def _build_weights_sliced(weight_oihw, cout_pad):
    """OIHW -> (9*Cin, cout_pad): only the nonzero K rows, packed as
       [ center(4C) | left@g(0,1)(C) | left@g(1,1)(C) | up(2C) | up-left(C) ]."""
    o, c, _, _ = weight_oihw.shape
    w = weight_oihw
    w0 = jnp.transpose(w[:, :, 1:3, 1:3], (2, 3, 1, 0)).reshape(4 * c, o)
    w1a = jnp.transpose(w[:, :, 1, 0], (1, 0))                       # g=(0,1)
    w1b = jnp.transpose(w[:, :, 2, 0], (1, 0))                       # g=(1,1)
    w2 = jnp.transpose(w[:, :, 0, 1:3], (2, 1, 0)).reshape(2 * c, o)  # g=(1,0),(1,1)
    w3 = jnp.transpose(w[:, :, 0, 0], (1, 0))                        # g=(1,1)
    wcat = jnp.concatenate([w0, w1a, w1b, w2, w3], axis=0)
    return jnp.pad(wcat, ((0, 0), (0, cout_pad - o)))


def _pick_tco(cout_pad):
    """256-wide Cout tiles for the 256x256 MXUs (v6e/v7x), 128 on v5e."""
    try:
        kind = jax.devices()[0].device_kind.lower()
        is_v5e = ("v5 lite" in kind) or ("v5e" in kind) or ("v5litepod" in kind)
    except Exception:
        is_v5e = False
    if is_v5e:
        return 128
    return 256 if cout_pad % 256 == 0 else 128


# --------------------------------------------------------------------------- #
# Wrapper
# --------------------------------------------------------------------------- #
def downsample_forward(x_nchw, weight_oihw, bias, *, row_block=None,
                       nhwc_out=False, vmem_budget_bytes=36 * 1024 * 1024):
    """Equivalent of Downsample(channels, use_conv=True, dims=2).forward(x)."""
    n, c, h, w = x_nchw.shape
    cout = weight_oihw.shape[0]
    assert weight_oihw.shape[1] == c, "channel mismatch"
    if h % 2 or w % 2:
        # TODO(synk): odd H/W (Ho = (H-1)//2 + 1) needs an extra boundary tap row/col.
        raise NotImplementedError("downsample_forward requires even H and W")
    ho, wo = h // 2, w // 2
    k4 = 4 * c

    # Lane-dense Cout: pad only the (small) weights/bias, never the activations.
    cout_pad = ((cout + 127) // 128) * 128
    tco = _pick_tco(cout_pad)
    n_co = cout_pad // tco

    sliced = (c % 128 == 0)            # K-sliced taps need lane-aligned Cin slices
    w_tile_bytes = (9 if sliced else 16) * c * tco * 2     # bf16 weight tile

    out_dtype = x_nchw.dtype
    out_bytes = jnp.dtype(out_dtype).itemsize
    use_acc = jnp.dtype(out_dtype) != jnp.dtype(jnp.float32)

    def vmem_est(tr):
        xs_blk = tr * wo * k4 * 2
        seam_blk = wo * k4 * 2
        o_blk = tr * wo * tco * out_bytes
        acc_blk = tr * wo * tco * 4 if use_acc else 0
        return 2 * (xs_blk + seam_blk + w_tile_bytes + tco * 4 + o_blk) + acc_blk

    # Output-row tiling: biggest divisor of Ho whose working set fits the
    # budget (budget chosen so the kernel also fits v7x's 64 MiB VMEM).
    if row_block is None:
        tr = 1
        for cand in range(ho, 0, -1):
            if ho % cand == 0 and vmem_est(cand) <= vmem_budget_bytes:
                tr = cand
                break
    else:
        assert ho % row_block == 0, "row_block must divide H//2"
        tr = int(row_block)
    nr = ho // tr

    # Single HBM layout pass: NCHW -> space-to-depth NHWC, cast to bf16:
    #   xs[n, i, j, (2*dh + dw)*C + cc] = x[n, cc, 2*i + dh, 2*j + dw]
    xs = x_nchw.reshape(n, c, ho, 2, wo, 2)
    xs = jnp.transpose(xs, (0, 2, 4, 3, 5, 1)).reshape(n, ho, wo, k4)
    xs = xs.astype(jnp.bfloat16)

    if sliced:
        wt = _build_weights_sliced(weight_oihw, cout_pad).astype(jnp.bfloat16)
        w_spec_shape = (9 * c, tco)
    else:
        wt = _build_weights_dense(weight_oihw, cout_pad).astype(jnp.bfloat16)
        w_spec_shape = (4, 4 * c, tco)
    b2 = jnp.pad(bias.astype(jnp.float32), (0, cout_pad - cout)).reshape(1, cout_pad)

    # Grid order: hold the larger operand resident.  co innermost -> each xs
    # row block is fetched once and reused across Cout tiles; co outermost ->
    # each weight tile is fetched once and reused across (image, row) blocks.
    xs_bytes = xs.size * 2
    w_bytes = wt.size * 2
    co_outer = (n_co * xs_bytes + w_bytes) < (xs_bytes + n * nr * w_bytes)

    def w_idx(co):
        return (0, co) if sliced else (0, 0, co)

    if co_outer:
        grid = (n_co, n, nr)
        row_axis = 2
        xs_map = lambda co, b, r: (b, r, 0, 0)
        sm_map = lambda co, b, r: (b, jnp.maximum(r * tr - 1, 0), 0, 0)
        w_map = lambda co, b, r: w_idx(co)
        b_map = lambda co, b, r: (0, co)
        o_map = lambda co, b, r: (b, r, 0, co)
    else:
        grid = (n, nr, n_co)
        row_axis = 1
        xs_map = lambda b, r, co: (b, r, 0, 0)
        sm_map = lambda b, r, co: (b, jnp.maximum(r * tr - 1, 0), 0, 0)
        w_map = lambda b, r, co: w_idx(co)
        b_map = lambda b, r, co: (0, co)
        o_map = lambda b, r, co: (b, r, 0, co)

    scratch = [pltpu.VMEM((tr, wo, tco), jnp.float32)] if use_acc else []
    vmem_limit = int(min(max(vmem_est(tr) + (8 << 20), 32 << 20), 96 << 20))

    kernel = functools.partial(_downsample_kernel, cin=c, sliced=sliced,
                               row_axis=row_axis)

    out = pl.pallas_call(
        kernel,
        out_shape=jax.ShapeDtypeStruct((n, ho, wo, cout_pad), out_dtype),
        grid_spec=pltpu.PrefetchScalarGridSpec(
            num_scalar_prefetch=0,
            grid=grid,
            in_specs=[
                pl.BlockSpec((None, tr, wo, k4), xs_map),
                pl.BlockSpec((None, 1, wo, k4), sm_map),   # 1-row seam halo
                pl.BlockSpec(w_spec_shape, w_map),
                pl.BlockSpec((1, tco), b_map),
            ],
            out_specs=pl.BlockSpec((None, tr, wo, tco), o_map),
            scratch_shapes=scratch,
        ),
        compiler_params=pltpu.CompilerParams(
            dimension_semantics=("parallel", "parallel", "parallel"),
            vmem_limit_bytes=vmem_limit,
        ),
    )(xs, xs, wt, b2)

    out = out[..., :cout]
    if nhwc_out:
        return out
    # TODO(synk): accept/emit NHWC end-to-end so both wrapper layout passes disappear.
    return jnp.transpose(out, (0, 3, 1, 2))


# --------------------------------------------------------------------------- #
# Self-test
# --------------------------------------------------------------------------- #
if __name__ == "__main__":
    base_key = jax.random.PRNGKey(0)

    def ref_conv(x, weight, b):
        # Same bf16 operands / f32 accumulation as the kernel's MXU path.
        y = jax.lax.conv_general_dilated(
            x.astype(jnp.bfloat16), weight.astype(jnp.bfloat16),
            window_strides=(2, 2), padding=((1, 1), (1, 1)),
            dimension_numbers=("NCHW", "OIHW", "NCHW"),
            preferred_element_type=jnp.float32)
        return y + b[None, :, None, None].astype(jnp.float32)

    def run_case(idx, n, cin, cout, hw, row_block, xdtype, tol):
        k = jax.random.fold_in(base_key, idx)
        kx, kw_, kb = jax.random.split(k, 3)
        x = jax.random.normal(kx, (n, cin, hw, hw), dtype=jnp.float32).astype(xdtype)
        weight = jax.random.normal(kw_, (cout, cin, 3, 3), dtype=jnp.float32) * 0.1
        b = jax.random.normal(kb, (cout,), dtype=jnp.float32) * 0.1
        out = jax.block_until_ready(
            downsample_forward(x, weight, b, row_block=row_block))
        ref = jax.block_until_ready(ref_conv(x, weight, b))
        assert out.shape == (n, cout, hw // 2, hw // 2), (idx, out.shape)
        err = float(jnp.max(jnp.abs(out.astype(jnp.float32) - ref)))
        assert err < tol, (idx, err)

    # Dense-K path (Cin not lane-aligned), multiple row blocks -> seam path.
    run_case(0, n=2, cin=4, cout=8, hw=16, row_block=2,
             xdtype=jnp.float32, tol=5e-3)
    # Lane-aligned Cin -> K-sliced 9*Cin path, row blocks + seam.
    run_case(1, n=1, cin=128, cout=256, hw=16, row_block=4,
             xdtype=jnp.float32, tol=2e-2)
    # bf16 activations -> f32 scratch accumulator + bf16 output store.
    run_case(2, n=1, cin=4, cout=4, hw=16, row_block=None,
             xdtype=jnp.bfloat16, tol=3e-2)

    print("KERNEL_OK")
</pallas_src>

<mosaic_0001>
module attributes {stable_mosaic.version = 11 : i64} {
  func.func @_downsample_kernel(%arg0: i32, %arg1: i32, %arg2: i32, %arg3: memref<1x2x8x16xbf16, #tpu.memory_space<vmem>>, %arg4: memref<1x1x8x16xbf16, #tpu.memory_space<vmem>>, %arg5: memref<4x16x128xbf16, #tpu.memory_space<vmem>>, %arg6: memref<1x128xf32, #tpu.memory_space<vmem>>, %arg7: memref<1x2x8x128xf32, #tpu.memory_space<vmem>>) attributes {dimension_semantics = [#tpu.dimension_semantics<parallel>, #tpu.dimension_semantics<parallel>, #tpu.dimension_semantics<parallel>], iteration_bounds = array<i64: 1, 2, 4>, scalar_prefetch = 0 : i64, scratch_operands = 0 : i64, tpu.core_type = #tpu.core_type<tc>, window_params = [{transform_indices = @transform_0, window_bounds = array<i64: 1, 2, 8, 16>}, {transform_indices = @transform_1, window_bounds = array<i64: 1, 1, 8, 16>}, {transform_indices = @transform_2, window_bounds = array<i64: 4, 16, 128>}, {transform_indices = @transform_3, window_bounds = array<i64: 1, 128>}, {transform_indices = @transform_4, window_bounds = array<i64: 1, 2, 8, 128>}]} {
    %c0 = arith.constant 0 : index
    %c0_0 = arith.constant 0 : index
    %c0_1 = arith.constant 0 : index
    %c0_2 = arith.constant 0 : index
    %0 = vector.load %arg3[%c0, %c0_0, %c0_1, %c0_2] : memref<1x2x8x16xbf16, #tpu.memory_space<vmem>>, vector<1x2x8x16xbf16>
    %1 = vector.shape_cast %0 : vector<1x2x8x16xbf16> to vector<2x8x16xbf16>
    %2 = vector.shape_cast %1 : vector<2x8x16xbf16> to vector<16x16xbf16>
    %c0_3 = arith.constant 0 : index
    %c0_4 = arith.constant 0 : index
    %c0_5 = arith.constant 0 : index
    %3 = vector.load %arg5[%c0_3, %c0_4, %c0_5] : memref<4x16x128xbf16, #tpu.memory_space<vmem>>, vector<1x16x128xbf16>
    %4 = vector.shape_cast %3 : vector<1x16x128xbf16> to vector<16x128xbf16>
    %cst = arith.constant dense<0.000000e+00> : vector<16x128xf32>
    %5 = tpu.matmul %2, %4, %cst {dimension_numbers = #tpu.dot_dimension_numbers<[1], [0], [0], [1], [0, 0, 1, 1], [], []>} : vector<16x16xbf16>, vector<16x128xbf16>, vector<16x128xf32> -> vector<16x128xf32>
    %c1 = arith.constant 1 : index
    %c0_6 = arith.constant 0 : index
    %c0_7 = arith.constant 0 : index
    %6 = vector.load %arg5[%c1, %c0_6, %c0_7] : memref<4x16x128xbf16, #tpu.memory_space<vmem>>, vector<1x16x128xbf16>
    %7 = vector.shape_cast %6 : vector<1x16x128xbf16> to vector<16x128xbf16>
    %cst_8 = arith.constant dense<0.000000e+00> : vector<16x128xf32>
    %8 = tpu.matmul %2, %7, %cst_8 {dimension_numbers = #tpu.dot_dimension_numbers<[1], [0], [0], [1], [0, 0, 1, 1], [], []>} : vector<16x16xbf16>, vector<16x128xbf16>, vector<16x128xf32> -> vector<16x128xf32>
    %c2 = arith.constant 2 : index
    %c0_9 = arith.constant 0 : index
    %c0_10 = arith.constant 0 : index
    %9 = vector.load %arg5[%c2, %c0_9, %c0_10] : memref<4x16x128xbf16, #tpu.memory_space<vmem>>, vector<1x16x128xbf16>
    %10 = vector.shape_cast %9 : vector<1x16x128xbf16> to vector<16x128xbf16>
    %cst_11 = arith.constant dense<0.000000e+00> : vector<16x128xf32>
    %11 = tpu.matmul %2, %10, %cst_11 {dimension_numbers = #tpu.dot_dimension_numbers<[1], [0], [0], [1], [0, 0, 1, 1], [], []>} : vector<16x16xbf16>, vector<16x128xbf16>, vector<16x128xf32> -> vector<16x128xf32>
    %c3 = arith.constant 3 : index
    %c0_12 = arith.constant 0 : index
    %c0_13 = arith.constant 0 : index
    %12 = vector.load %arg5[%c3, %c0_12, %c0_13] : memref<4x16x128xbf16, #tpu.memory_space<vmem>>, vector<1x16x128xbf16>
    %13 = vector.shape_cast %12 : vector<1x16x128xbf16> to vector<16x128xbf16>
    %cst_14 = arith.constant dense<0.000000e+00> : vector<16x128xf32>
    %14 = tpu.matmul %2, %13, %cst_14 {dimension_numbers = #tpu.dot_dimension_numbers<[1], [0], [0], [1], [0, 0, 1, 1], [], []>} : vector<16x16xbf16>, vector<16x128xbf16>, vector<16x128xf32> -> vector<16x128xf32>
    %15 = vector.shape_cast %5 : vector<16x128xf32> to vector<2x8x128xf32>
    %16 = vector.shape_cast %8 : vector<16x128xf32> to vector<2x8x128xf32>
    %17 = vector.shape_cast %11 : vector<16x128xf32> to vector<2x8x128xf32>
    %18 = vector.shape_cast %14 : vector<16x128xf32> to vector<2x8x128xf32>
    %c0_15 = arith.constant 0 : index
    %c0_16 = arith.constant 0 : index
    %19 = vector.load %arg6[%c0_15, %c0_16] : memref<1x128xf32, #tpu.memory_space<vmem>>, vector<1x128xf32>
    %20 = vector.shape_cast %19 : vector<1x128xf32> to vector<1x1x128xf32>
    %21 = vector.broadcast %20 : vector<1x1x128xf32> to vector<2x8x128xf32>
    %22 = arith.addf %15, %21 : vector<2x8x128xf32>
    %c0_17 = arith.constant 0 : index
    %c0_18 = arith.constant 0 : index
    %c0_19 = arith.constant 0 : index
    %c0_20 = arith.constant 0 : index
    %23 = vector.load %arg7[%c0_17, %c0_18, %c0_19, %c0_20] : memref<1x2x8x128xf32, #tpu.memory_space<vmem>>, vector<1x2x8x128xf32>
    %24 = vector.shape_cast %23 : vector<1x2x8x128xf32> to vector<2x8x128xf32>
    %25 = vector.shape_cast %22 : vector<2x8x128xf32> to vector<1x2x8x128xf32>
    tpu.vector_store %arg7[%c0_17, %c0_18, %c0_19, %c0_20], %25 {strides = array<i32>} : memref<1x2x8x128xf32, #tpu.memory_space<vmem>>, vector<1x2x8x128xf32>,
    %c0_21 = arith.constant 0 : index
    %c0_22 = arith.constant 0 : index
    %c1_23 = arith.constant 1 : index
    %c0_24 = arith.constant 0 : index
    %26 = vector.load %arg7[%c0_21, %c0_22, %c1_23, %c0_24] : memref<1x2x8x128xf32, #tpu.memory_space<vmem>>, vector<1x2x7x128xf32>
    %27 = vector.shape_cast %26 : vector<1x2x7x128xf32> to vector<2x7x128xf32>
    %28 = vector.extract_strided_slice %16 {offsets = [0, 0, 0], sizes = [2, 7, 128], strides = [1, 1, 1]} : vector<2x8x128xf32> to vector<2x7x128xf32>
    %29 = arith.addf %27, %28 : vector<2x7x128xf32>
    %c0_25 = arith.constant 0 : index
    %c0_26 = arith.constant 0 : index
    %c1_27 = arith.constant 1 : index
    %c0_28 = arith.constant 0 : index
    %30 = vector.load %arg7[%c0_25, %c0_26, %c1_27, %c0_28] : memref<1x2x8x128xf32, #tpu.memory_space<vmem>>, vector<1x2x7x128xf32>
    %31 = vector.shape_cast %30 : vector<1x2x7x128xf32> to vector<2x7x128xf32>
    %32 = vector.shape_cast %29 : vector<2x7x128xf32> to vector<1x2x7x128xf32>
    tpu.vector_store %arg7[%c0_25, %c0_26, %c1_27, %c0_28], %32 {strides = array<i32>} : memref<1x2x8x128xf32, #tpu.memory_space<vmem>>, vector<1x2x7x128xf32>,
    %c0_29 = arith.constant 0 : index
    %c1_30 = arith.constant 1 : index
    %c0_31 = arith.constant 0 : index
    %c0_32 = arith.constant 0 : index
    %33 = vector.load %arg7[%c0_29, %c1_30, %c0_31, %c0_32] : memref<1x2x8x128xf32, #tpu.memory_space<vmem>>, vector<1x1x8x128xf32>
    %34 = vector.shape_cast %33 : vector<1x1x8x128xf32> to vector<1x8x128xf32>
    %35 = vector.extract_strided_slice %17 {offsets = [0, 0, 0], sizes = [1, 8, 128], strides = [1, 1, 1]} : vector<2x8x128xf32> to vector<1x8x128xf32>
    %36 = arith.addf %34, %35 : vector<1x8x128xf32>
    %c0_33 = arith.constant 0 : index
    %c1_34 = arith.constant 1 : index
    %c0_35 = arith.constant 0 : index
    %c0_36 = arith.constant 0 : index
    %37 = vector.load %arg7[%c0_33, %c1_34, %c0_35, %c0_36] : memref<1x2x8x128xf32, #tpu.memory_space<vmem>>, vector<1x1x8x128xf32>
    %38 = vector.shape_cast %37 : vector<1x1x8x128xf32> to vector<1x8x128xf32>
    %39 = vector.shape_cast %36 : vector<1x8x128xf32> to vector<1x1x8x128xf32>
    tpu.vector_store %arg7[%c0_33, %c1_34, %c0_35, %c0_36], %39 {strides = array<i32>} : memref<1x2x8x128xf32, #tpu.memory_space<vmem>>, vector<1x1x8x128xf32>,
    %c0_37 = arith.constant 0 : index
    %c1_38 = arith.constant 1 : index
    %c1_39 = arith.constant 1 : index
    %c0_40 = arith.constant 0 : index
    %40 = vector.load %arg7[%c0_37, %c1_38, %c1_39, %c0_40] : memref<1x2x8x128xf32, #tpu.memory_space<vmem>>, vector<1x1x7x128xf32>
    %41 = vector.shape_cast %40 : vector<1x1x7x128xf32> to vector<1x7x128xf32>
    %42 = vector.extract_strided_slice %18 {offsets = [0, 0, 0], sizes = [1, 7, 128], strides = [1, 1, 1]} : vector<2x8x128xf32> to vector<1x7x128xf32>
    %43 = arith.addf %41, %42 : vector<1x7x128xf32>
    %c0_41 = arith.constant 0 : index
    %c1_42 = arith.constant 1 : index
    %c1_43 = arith.constant 1 : index
    %c0_44 = arith.constant 0 : index
    %44 = vector.load %arg7[%c0_41, %c1_42, %c1_43, %c0_44] : memref<1x2x8x128xf32, #tpu.memory_space<vmem>>, vector<1x1x7x128xf32>
    %45 = vector.shape_cast %44 : vector<1x1x7x128xf32> to vector<1x7x128xf32>
    %46 = vector.shape_cast %43 : vector<1x7x128xf32> to vector<1x1x7x128xf32>
    tpu.vector_store %arg7[%c0_41, %c1_42, %c1_43, %c0_44], %46 {strides = array<i32>} : memref<1x2x8x128xf32, #tpu.memory_space<vmem>>, vector<1x1x7x128xf32>,
    %c0_i32 = arith.constant 0 : i32
    %47 = arith.cmpi sgt, %arg2, %c0_i32 : i32
    %48 = arith.extui %47 : i1 to i32
    %c0_i32_45 = arith.constant 0 : i32
    %49 = arith.cmpi ne, %48, %c0_i32_45 : i32
    scf.if %49 {
      %c0_46 = arith.constant 0 : index
      %c0_47 = arith.constant 0 : index
      %c0_48 = arith.constant 0 : index
      %c0_49 = arith.constant 0 : index
      %50 = vector.load %arg4[%c0_46, %c0_47, %c0_48, %c0_49] : memref<1x1x8x16xbf16, #tpu.memory_space<vmem>>, vector<1x1x8x16xbf16>
      %51 = vector.shape_cast %50 : vector<1x1x8x16xbf16> to vector<1x8x16xbf16>
      %52 = vector.shape_cast %51 : vector<1x8x16xbf16> to vector<8x16xbf16>
      %c2_50 = arith.constant 2 : index
      %c0_51 = arith.constant 0 : index
      %c0_52 = arith.constant 0 : index
      %53 = vector.load %arg5[%c2_50, %c0_51, %c0_52] : memref<4x16x128xbf16, #tpu.memory_space<vmem>>, vector<1x16x128xbf16>
      %54 = vector.shape_cast %53 : vector<1x16x128xbf16> to vector<16x128xbf16>
      %cst_53 = arith.constant dense<0.000000e+00> : vector<8x128xf32>
      %55 = tpu.matmul %52, %54, %cst_53 {dimension_numbers = #tpu.dot_dimension_numbers<[1], [0], [0], [1], [0, 0, 1, 1], [], []>} : vector<8x16xbf16>, vector<16x128xbf16>, vector<8x128xf32> -> vector<8x128xf32>
      %c3_54 = arith.constant 3 : index
      %c0_55 = arith.constant 0 : index
      %c0_56 = arith.constant 0 : index
      %56 = vector.load %arg5[%c3_54, %c0_55, %c0_56] : memref<4x16x128xbf16, #tpu.memory_space<vmem>>, vector<1x16x128xbf16>
      %57 = vector.shape_cast %56 : vector<1x16x128xbf16> to vector<16x128xbf16>
      %cst_57 = arith.constant dense<0.000000e+00> : vector<8x128xf32>
      %58 = tpu.matmul %52, %57, %cst_57 {dimension_numbers = #tpu.dot_dimension_numbers<[1], [0], [0], [1], [0, 0, 1, 1], [], []>} : vector<8x16xbf16>, vector<16x128xbf16>, vector<8x128xf32> -> vector<8x128xf32>
      %c0_58 = arith.constant 0 : index
      %c0_59 = arith.constant 0 : index
      %c0_60 = arith.constant 0 : index
      %c0_61 = arith.constant 0 : index
      %59 = vector.load %arg7[%c0_58, %c0_59, %c0_60, %c0_61] : memref<1x2x8x128xf32, #tpu.memory_space<vmem>>, vector<1x1x8x128xf32>
      %60 = vector.shape_cast %59 : vector<1x1x8x128xf32> to vector<1x8x128xf32>
      %61 = vector.shape_cast %55 : vector<8x128xf32> to vector<1x8x128xf32>
      %62 = arith.addf %60, %61 : vector<1x8x128xf32>
      %c0_62 = arith.constant 0 : index
      %c0_63 = arith.constant 0 : index
      %c0_64 = arith.constant 0 : index
      %c0_65 = arith.constant 0 : index
      %63 = vector.load %arg7[%c0_62, %c0_63, %c0_64, %c0_65] : memref<1x2x8x128xf32, #tpu.memory_space<vmem>>, vector<1x1x8x128xf32>
      %64 = vector.shape_cast %63 : vector<1x1x8x128xf32> to vector<1x8x128xf32>
      %65 = vector.shape_cast %62 : vector<1x8x128xf32> to vector<1x1x8x128xf32>
      tpu.vector_store %arg7[%c0_62, %c0_63, %c0_64, %c0_65], %65 {strides = array<i32>} : memref<1x2x8x128xf32, #tpu.memory_space<vmem>>, vector<1x1x8x128xf32>,
      %c0_66 = arith.constant 0 : index
      %c0_67 = arith.constant 0 : index
      %c1_68 = arith.constant 1 : index
      %c0_69 = arith.constant 0 : index
      %66 = vector.load %arg7[%c0_66, %c0_67, %c1_68, %c0_69] : memref<1x2x8x128xf32, #tpu.memory_space<vmem>>, vector<1x1x7x128xf32>
      %67 = vector.shape_cast %66 : vector<1x1x7x128xf32> to vector<1x7x128xf32>
      %68 = vector.extract_strided_slice %58 {offsets = [0, 0], sizes = [7, 128], strides = [1, 1]} : vector<8x128xf32> to vector<7x128xf32>
      %69 = vector.shape_cast %68 : vector<7x128xf32> to vector<1x7x128xf32>
      %70 = arith.addf %67, %69 : vector<1x7x128xf32>
      %c0_70 = arith.constant 0 : index
      %c0_71 = arith.constant 0 : index
      %c1_72 = arith.constant 1 : index
      %c0_73 = arith.constant 0 : index
      %71 = vector.load %arg7[%c0_70, %c0_71, %c1_72, %c0_73] : memref<1x2x8x128xf32, #tpu.memory_space<vmem>>, vector<1x1x7x128xf32>
      %72 = vector.shape_cast %71 : vector<1x1x7x128xf32> to vector<1x7x128xf32>
      %73 = vector.shape_cast %70 : vector<1x7x128xf32> to vector<1x1x7x128xf32>
      tpu.vector_store %arg7[%c0_70, %c0_71, %c1_72, %c0_73], %73 {strides = array<i32>} : memref<1x2x8x128xf32, #tpu.memory_space<vmem>>, vector<1x1x7x128xf32>,
    } else {
    }
    return
  }
  func.func @transform_0(%arg0: i32, %arg1: i32, %arg2: i32) -> (i32, i32, i32, i32) {
    %c0_i32 = arith.constant 0 : i32
    %c0_i32_0 = arith.constant 0 : i32
    %c0_i32_1 = arith.constant 0 : i32
    return %arg1, %arg2, %c0_i32, %c0_i32_0 : i32, i32, i32, i32
  }
  func.func @transform_1(%arg0: i32, %arg1: i32, %arg2: i32) -> (i32, i32, i32, i32) {
    %c2_i32 = arith.constant 2 : i32
    %0 = arith.muli %arg2, %c2_i32 : i32
    %c1_i32 = arith.constant 1 : i32
    %1 = arith.subi %0, %c1_i32 : i32
    %c0_i32 = arith.constant 0 : i32
    %2 = arith.maxsi %1, %c0_i32 : i32
    %c0_i32_0 = arith.constant 0 : i32
    %c0_i32_1 = arith.constant 0 : i32
    %c0_i32_2 = arith.constant 0 : i32
    return %arg1, %2, %c0_i32_0, %c0_i32_1 : i32, i32, i32, i32
  }
  func.func @transform_2(%arg0: i32, %arg1: i32, %arg2: i32) -> (i32, i32, i32) {
    %c0_i32 = arith.constant 0 : i32
    %c0_i32_0 = arith.constant 0 : i32
    %c0_i32_1 = arith.constant 0 : i32
    return %c0_i32, %c0_i32_0, %arg0 : i32, i32, i32
  }
  func.func @transform_3(%arg0: i32, %arg1: i32, %arg2: i32) -> (i32, i32) {
    %c0_i32 = arith.constant 0 : i32
    %c0_i32_0 = arith.constant 0 : i32
    return %c0_i32, %arg0 : i32, i32
  }
  func.func @transform_4(%arg0: i32, %arg1: i32, %arg2: i32) -> (i32, i32, i32, i32) {
    %c0_i32 = arith.constant 0 : i32
    %c0_i32_0 = arith.constant 0 : i32
    return %arg1, %arg2, %c0_i32, %arg0 : i32, i32, i32, i32
  }
}

</mosaic_0001>

<bundles_post_ra>
// kernel: tpu_custom_call.1
= control target key start
LH: loop header
LB: loop body
LE: loop exit
PB: predicated region body
PF: predicated region fallthrough
CT: control target
= control target key end

     0   :  { %s1721_s0 = inlined_call_operand.hbm [shape: bf16[2,8,8,16], index: 0, kind: input, shape index: {}]   ;;  %s1722_s1 = inlined_call_operand.hbm [shape: bf16[2,8,8,16], index: 1, kind: input, shape index: {}]   ;;  %s1723_s2 = inlined_call_operand.hbm [shape: bf16[4,16,128], index: 2, kind: input, shape index: {}]   ;;  %s1724_s3 = inlined_call_operand.vmem [shape: f32[1,128], index: 3, kind: input, shape index: {}]   ;;  %s1725_s4 = inlined_call_operand.hbm [shape: f32[2,8,8,128], index: 4, kind: output, shape index: {}]  }
   0x1   :  { %1742 = sst [smem:[#allocation20_spill]] %s1721_s0 }
   0x2   :  { %1743 = sst [smem:[#allocation21_spill]] %s1723_s2 }
   0x3   :  { %9 = vsyncpa [#allocation3], 0 }
   0x4   :  { %11 = vsyncpa [#allocation3 + $0x1], 0 }
   0x5   :  { %12 = vsyncpa [#allocation6], 0 }
   0x6   :  { %14 = vsyncpa [#allocation6 + $0x1], 0 }
   0x7   :  { %15 = vsyncpa [#allocation4], 0 }
   0x8   :  { %17 = vsyncpa [#allocation4 + $0x1], 0  ;;  %s1326_s15 = smov 0   ;;  %s1328_s16 = smov 0  }
   0x9   :  { %s1330_s17 = smov 0   ;;  %s1332_s18 = smov 0  }
   0xa   :  { %s1334_s19 = smov 0   ;;  %s1336_s20 = smov 0  }
   0xb   :  { %s1338_s21 = smov 0   ;;  %s1340_s22 = smov 0  }
   0xc   :  { %s1342_s23 = smov 0   ;;  %s1344_s24 = smov 0  }
   0xd   :  { %s1346_s25 = smov 0  }
   0xe LB: > { %1744 = sst [smem:[#allocation13_spill]] %s1259_s18  ;;  %s1382_s26 = sadd.s32 4294967295, %s1287_s25   ;;  %s1287_s25 = sphi %s1346_s25, %s23_s25   ;;  %s1283_s24 = sphi %s1344_s24, %s1792_s24   ;;  %s1279_s23 = sphi %s1342_s23, %s1784_s23   ;;  %s1275_s22 = sphi %s1340_s22, %s1791_s22   ;;  %s1271_s21 = sphi %s1338_s21, %s1783_s21   ;;  %s1267_s20 = sphi %s1336_s20, %s1782_s20   ;;  %s1263_s19 = sphi %s1334_s19, %s1790_s19   ;;  %s1259_s18 = sphi %s1332_s18, %s1789_s18   ;;  %s1255_s17 = sphi %s1330_s17, %s1788_s17   ;;  %s1251_s16 = sphi %s1328_s16, %s1787_s16   ;;  %s1247_s15 = sphi %s1326_s15, %s1786_s15  }
   0xf   : > { %1745 = sst [smem:[#allocation14_spill]] %s1267_s20  ;;  %s840_s27 = sadd.s32 4294967294, %s1287_s25  }
  0x10   : > { %1746 = sst [smem:[#allocation15_spill]] %s1279_s23  ;;  %p64_p0 = scmp.ne.s32.totalorder %s1263_s19, %s1259_s18 }
  0x11   : > { %p1726_p1 = scmp.eq.s32.totalorder %s1382_s26, 0  ;;  %p186_p3 = scmp.eq.s32.totalorder %s840_s27, 7 }
  0x12   : > { %p845_p5 = scmp.ge.s32.totalorder %s1287_s25, 1  ;;  %p193_p7 = scmp.lt.s32.totalorder %s1287_s25, 9 }
  0x13   : > { %p1391_p4 = por %p1726_p1, %p64_p0  ;;  %p1396_p6 = por %p186_p3, %p64_p0 }
  0x14   : > { %p1401_p8 = pnand %p845_p5, %p193_p7  ;;  %s1289_s5 = smov [#allocation7]  }
  0x15   : > { %s1747_s28 = scalar_select %p1391_p4, 1, 0 }
  0x16   : > { %s1748_s29 = scalar_select %p1396_p6, 1, 0 }
  0x17   : > { %s1750_s30 = scalar_select %p1401_p8, 1, 0 }
  0x18   : > { %1749 = sst [smem:[#allocation16_spill]] %s1748_s29  ;;  %s207_s6 = sshll.u32 %s1289_s5, 4  ;;  %s208_s6 = int_to_ptr.vmem [resolvable:$true] %s207_s6 }
  0x19   : > { %p946_p9 = pneg %p1401_p8  ;;  %s1752_s2 = sld [smem:[#allocation21_spill]] }
  0x1b   : > { %p1409_p10 = pnand %p946_p9, %p1726_p1 }
  0x1d   : > { %p1071_p12 = pneg %p1409_p10 }
  0x1f   : > { %s1069_s10 = scalar_lea.hbm %s1752_s2, 512 }
  0x20   : > { %p1070_p11 = scmp.ne.s32.totalorder %s1752_s2, %s1069_s10  ;;  %p1076_p3 = scmp.lt.u32.totalorder %s1069_s10, %s1752_s2 }
  0x22   : > { %p1072_p13 = pnand %p1071_p12, %p1070_p11 }
  0x24   : > { %p1073_p0 = pneg %p1072_p13 }
  0x26   : > { %p1078_p5 = pnand %p1076_p3, %p1073_p0 }
  0x28   : > { %1081 = shalt.err (!%p1078_p5)
}
  0x29   : > { %s1082_s27 = scalar_lea.vmem %s208_s6, 512  ;;  %p1090_p2 = scmp.lt.s32.totalorder %s208_s6, %s208_s6 }
  0x2a   : > { %p1083_p7 = scmp.ne.s32.totalorder %s208_s6, %s1082_s27  ;;  %p1091_p6 = scmp.lt.s32.totalorder %s1082_s27, %s1082_s27 }
  0x2c   : > { %p1085_p9 = pnand %p1083_p7, %p1071_p12  ;;  %p1092_p4 = por %p1091_p6, %p1090_p2 }
  0x2e   : > { %p1086_p1 = pneg %p1085_p9 }
  0x30   : > { %p1093_p8 = pnand %p1092_p4, %p1086_p1 }
  0x32   : > { %1096 = shalt.err (!%p1093_p8)
}
  0x33   : > { %s1730_s5 = smov 64   ;;  %s1731_s8 = smov 4  }
  0x34   : > { %949 = dma.hbm_to_vmem [thread:$0]  (!%p1409_p10), %s1752_s2, 512, %s208_s6, [#allocation6], %s1730_s5, %s1730_s5, %s1731_s8  }
  0x35   : > { %s1729_s11 = sadd.s32 1, %s1279_s23  ;;  %p58_p2 = scmp.ne.s32.totalorder %s1267_s20, %s1263_s19 }
  0x36   : > { %p1435_p1 = scmp.ge.s32.totalorder %s1729_s11, 4  ;;  %p1736_p4 = scmp.eq.s32.totalorder %s1287_s25, 0 }
  0x37   : > { %s841_s27 = sshll.u32 %s1279_s23, 1  ;;  %p1754_p6 = scmp.eq.s32.totalorder %s1382_s26, 7 }
  0x38   : > { %p1735_p11 = scmp.lt.s32.totalorder %s1287_s25, 8  ;;  %p60_p10 = por %p1736_p4, %p58_p2 }
  0x39   : > { %p1447_p8 = por %p1754_p6, %p58_p2  ;;  %s227_s6 = sand.u32 1, %s1267_s20  }
  0x3a   : > { %s849_s9 = sshll.u32 %s227_s6, 3  ;;  %s1734_s10 = sshll.u32 %s1283_s24, 3 }
  0x3b   : > { %s1755_s7 = scalar_select %p1447_p8, 1, 0 }
  0x3c   : > { %s237_s11 = sadd.s32 %s1734_s10, %s841_s27  ;;  %s231_s13 = scalar_lea.vmem [#allocation2], %s849_s9 }
  0x3d   : > { %s240_s14 = sshll.u32 %s231_s13, 4  ;;  %s852_s5 = sshll.u32 %s237_s11, 6  ;;  %s1460_s14 = int_to_ptr.vmem [resolvable:$true] %s240_s14 }
  0x3e   : > { %s1756_s0 = sld [smem:[#allocation20_spill]]  ;;  %p1469_p12 = pnand %p1735_p11, %p60_p10 }
  0x3f   : > { %s1473_s13 = scalar_lea.sflag [#allocation3], %s227_s6 }
  0x40   : > { %p1099_p0 = pneg %p1469_p12 }
  0x44   : > { %s1465_s29 = scalar_lea.hbm %s1756_s0, %s852_s5  ;;  %s1102_s8 = scalar_lea.hbm %s1756_s0, 1024 }
  0x45   : > { %s1097_s11 = scalar_lea.hbm %s1465_s29, 128  ;;  %p1103_p7 = scmp.lt.u32.totalorder %s1465_s29, %s1756_s0 }
  0x46   : > { %p1098_p13 = scmp.ne.s32.totalorder %s1465_s29, %s1097_s11  ;;  %p1104_p9 = scmp.lt.u32.totalorder %s1102_s8, %s1097_s11 }
  0x47   : > { %p1106_p6 = scmp.lt.u32.totalorder %s1097_s11, %s1465_s29 }
  0x48   : > { %p1100_p3 = pnand %p1099_p0, %p1098_p13  ;;  %p1105_p2 = por %p1104_p9, %p1103_p7 }
  0x4a   : > { %p1101_p5 = pneg %p1100_p3  ;;  %p1107_p10 = por %p1106_p6, %p1105_p2 }
  0x4c   : > { %p1108_p11 = pnand %p1107_p10, %p1101_p5 }
  0x4e   : > { %1111 = shalt.err (!%p1108_p11)
}
  0x4f   : > { %s1112_s6 = scalar_lea.vmem %s1460_s14, 128  ;;  %s1292_s2 = smov [#allocation2]  }
  0x50   : > { %p1113_p13 = scmp.ne.s32.totalorder %s1460_s14, %s1112_s6  ;;  %s1117_s5 = sshll.u32 %s1292_s2, 4  ;;  %s1118_s5 = int_to_ptr.vmem [resolvable:$false] %s1117_s5 }
  0x51   : > { %s1119_s10 = scalar_lea.vmem %s1118_s5, 256  ;;  %p1120_p8 = scmp.lt.s32.totalorder %s1460_s14, %s1118_s5 }
  0x52   : > { %p1115_p3 = pnand %p1113_p13, %p1099_p0  ;;  %p1121_p7 = scmp.lt.s32.totalorder %s1119_s10, %s1112_s6 }
  0x54   : > { %p1116_p4 = pneg %p1115_p3  ;;  %p1122_p9 = por %p1121_p7, %p1120_p8 }
  0x56   : > { %p1123_p2 = pnand %p1122_p9, %p1116_p4 }
  0x58   : > { %1126 = shalt.err (!%p1123_p2)
}
  0x59   : > { %s1758_s11 = smov 4   ;;  %s1759_s8 = smov 64  }
  0x5a   : > { %953 = dma.hbm_to_vmem [thread:$0]  (!%p1469_p12), %s1465_s29, 128, %s1460_s14, %s1473_s13, %s1759_s8, %s1759_s8, %s1758_s11  }
  0x5b   : > { %s842_s18 = sadd.s32 4294967295, %s841_s27  ;;  %s1760_s9 = sadd.s32 1, %s1279_s23 }
  0x5c   : > { %s1794_s9 = smov (%p1435_p1, %s1760_s9), 0  ;;  %s1762_s6 = sadd.s32 1, %s1283_s24 }
  0x5d   : > { %1761 = sst [smem:[#allocation17_spill]] %s1794_s9  ;;  %s1796_s6 = smov (!%p1435_p1, %s1762_s6), %s1283_s24 }
  0x5e   : > { %s47_s2 = ssub.s32 %s1279_s23, %s1794_s9  ;;  %p76_p4 = scmp.gt.s32.totalorder %s842_s18, 0 }
  0x5f   : > { %p40_p8 = scmp.ge.s32.totalorder %s1796_s6, 2  ;;  %s843_s29 = sshll.u32 %s1794_s9, 1 }
  0x60   : > { %s1798_s18 = smov (!%p76_p4, %s842_s18), 0  ;;  %s844_s14 = sadd.s32 4294967295, %s843_s29 }
  0x61   : > { %s1800_s6 = smov (%p40_p8, %s1796_s6), 0  ;;  %s87_s27 = sadd.s32 1, %s1255_s17 }
  0x62   : > { %1763 = sst [smem:[#allocation18_spill]] %s1800_s6  ;;  %s46_s12 = ssub.s32 %s1283_s24, %s1800_s6 }
  0x63   : > { %p80_p11 = scmp.gt.s32.totalorder %s844_s14, 0  ;;  %s48_s13 = sor.u32 %s47_s2, %s46_s12 }
  0x64   : > { %p94_p1 = scmp.ne.s32.totalorder %s1255_s17, %s1251_s16  ;;  %p49_p12 = scmp.eq.s32.totalorder %s48_s13, 0 }
  0x65   : > { %p100_p0 = scmp.ne.s32.totalorder %s1251_s16, %s1247_s15  ;;  %s1802_s14 = smov (!%p80_p11, %s844_s14), 0 }
  0x66   : > { %s1764_s5 = sadd.s32 1, %s1267_s20  ;;  %s83_s11 = ssub.s32 %s1798_s18, %s1802_s14 }
  0x67   : > { %s1532_s10 = scalar_select %p49_p12, %s1267_s20, %s1764_s5  }
  0x68   : > { %p1766_p5 = scmp.eq.s32.totalorder %s1287_s25, 0  ;;  %s84_s29 = sor.u32 %s83_s11, %s46_s12 }
  0x69   : > { %1765 = sst [smem:[#allocation19_spill]] %s1532_s10  ;;  %p1768_p10 = scmp.eq.s32.totalorder %s1382_s26, 0 }
  0x6a   : > { %p1536_p6 = por %p94_p1, %p1766_p5  ;;  %p85_p3 = scmp.eq.s32.totalorder %s84_s29, 0 }
  0x6b   : > { %p1542_p13 = por %p100_p0, %p1768_p10  ;;  %s250_s15 = sand.u32 1, %s1287_s25  }
  0x6c   : > { %s252_s2 = sand.u32 1, %s1255_s17   ;;  %s1770_s6 = sshll.u32 %s1283_s24, 3 }
  0x6d   : > { %s1549_s13 = scalar_select %p85_p3, %s1255_s17, %s87_s27  }
  0x6e   : > { %s853_s5 = sshll.u32 %s252_s2, 2  ;;  %s263_s14 = sadd.s32 %s1770_s6, %s1798_s18 }
  0x6f   : > { %s857_s9 = sshll.u32 %s263_s14, 6  ;;  %s254_s12 = scalar_lea.vmem [#allocation5], %s853_s5 }
  0x70   : > { %s1556_s20 = scalar_lea.hbm %s1722_s1, %s857_s9  ;;  %s267_s11 = sshll.u32 %s254_s12, 4  ;;  %s1558_s11 = int_to_ptr.vmem [resolvable:$true] %s267_s11 }
  0x71   : > { %p1771_p7 = scmp.lt.s32.totalorder %s1287_s25, 8  ;;  %s251_s18 = scalar_lea.sflag [#allocation6], %s250_s15 }
  0x72   : > { %s1127_s23 = scalar_lea.hbm %s1556_s20, 64  ;;  %s1132_s10 = scalar_lea.hbm %s1722_s1, 1024 }
  0x73   : > { %p1564_p9 = pnand %p1771_p7, %p1536_p6  ;;  %p1128_p2 = scmp.ne.s32.totalorder %s1556_s20, %s1127_s23 }
  0x74   : > { %p1133_p1 = scmp.lt.u32.totalorder %s1556_s20, %s1722_s1  ;;  %p1134_p12 = scmp.lt.u32.totalorder %s1132_s10, %s1127_s23 }
  0x75   : > { %p1129_p4 = pneg %p1564_p9  ;;  %p1136_p5 = scmp.lt.u32.totalorder %s1127_s23, %s1556_s20 }
  0x76   : > { %p1135_p0 = por %p1134_p12, %p1133_p1 }
  0x77   : > { %p1130_p8 = pnand %p1129_p4, %p1128_p2 }
  0x78   : > { %p1137_p6 = por %p1136_p5, %p1135_p0 }
  0x79   : > { %p1131_p11 = pneg %p1130_p8 }
  0x7b   : > { %p1138_p10 = pnand %p1137_p6, %p1131_p11 }
  0x7d   : > { %1141 = shalt.err (!%p1138_p10)
}
  0x7e   : > { %s1142_s15 = scalar_lea.vmem %s1558_s11, 64  ;;  %s1293_s2 = smov [#allocation5]  }
  0x7f   : > { %p1143_p3 = scmp.ne.s32.totalorder %s1558_s11, %s1142_s15  ;;  %s1147_s5 = sshll.u32 %s1293_s2, 4  ;;  %s1148_s5 = int_to_ptr.vmem [resolvable:$false] %s1147_s5 }
  0x80   : > { %s1149_s14 = scalar_lea.vmem %s1148_s5, 128  ;;  %p1150_p8 = scmp.lt.s32.totalorder %s1558_s11, %s1148_s5 }
  0x81   : > { %p1145_p7 = pnand %p1143_p3, %p1129_p4  ;;  %p1151_p1 = scmp.lt.s32.totalorder %s1149_s14, %s1142_s15 }
  0x83   : > { %p1146_p2 = pneg %p1145_p7  ;;  %p1152_p12 = por %p1151_p1, %p1150_p8 }
  0x85   : > { %p1153_p0 = pnand %p1152_p12, %p1146_p2 }
  0x87   : > { %1156 = shalt.err (!%p1153_p0)
}
  0x88   : > { %956 = dma.hbm_to_vmem [thread:$0]  (!%p1564_p9), %s1556_s20, 64, %s1558_s11, %s251_s18  }
  0x89   : > { %p1773_p11 = scmp.ne.s32.totalorder %s1750_s30, 0 }
  0x8a   : > { %s1596_s12 = sand.u32 (!%p1773_p11), 1, %s1263_s19   ;;  %p1774_p4 = scmp.ne.s32.totalorder (!%p1773_p11), %s1747_s28, 0 }
  0x8b   : > { %276 = sbr.rel (%p1773_p11) target bundleno = 627 (0x273), region = 36  ;;  %s859_s23 = sshll.u32 (!%p1773_p11), %s1596_s12, 3 }
  0x8c   : > { %s279_s9 = scalar_lea.sflag (!%p1773_p11), [#allocation3], %s1596_s12  ;;  %s282_s6 = scalar_lea.vmem (!%p1773_p11), [#allocation2], %s859_s23 }
  0x92   : > { %1230 = dma.done.wait (%p1774_p4), %s279_s9, 128  }
  0x93   : > { %1232 = vsyncadd (%p1774_p4), %s279_s9, 4294967168  ;;  %s287_s20 = sand.u32 1, %s1382_s26   ;;  %s289_s30 = sand.u32 1, %s1251_s16  }
  0x94   : > { %s1606_s11 = sshll.u32 %s289_s30, 2  ;;  %s288_s27 = scalar_lea.sflag [#allocation6], %s287_s20 }
  0x95   : > { %s291_s18 = scalar_lea.vmem [#allocation5], %s1606_s11 }
  0x96   : > { %1234 = dma.done.wait (%p1542_p13), %s288_s27, 64  }
  0x97   : > { %1236 = vsyncadd (%p1542_p13), %s288_s27, 4294967232  ;;  %p1775_p9 = scmp.eq.s32.totalorder %s1382_s26, 0 }
  0x99   : > { %1238 = dma.done.wait (%p1775_p9), [#allocation6], 512   ;;  %p1776_p5 = pmov %p1775_p9 }
  0x9a   : > { %v1294_v0 = vmov 0.0   ;;  %vm1295_vm0 = vmmov 0   ;;  %v1062_v1 = vld [vmem:[#allocation7] sm:$0xff]   ;;  %v1063_v2 = vld [vmem:[%s282_s6] sm:$0xff]   ;;  %vm353_vm1 = vcmask 130048   ;;  %v1066_v5 = vld [vmem:[#allocation7 + $0x18] sm:$0xff]  }
  0x9b   : > { %1240 = vsyncadd (%p1776_p5), [#allocation6], 4294966784  ;;  %900 = vmatprep.subr.bf16.mxu0 %v1294_v0  ;;  %902 = vmatprep.mubr.msk.bf16.mxu0 %vm1295_vm0, %v1294_v0  ;;  %v1064_v3 = vld [vmem:[#allocation7 + $0x8] sm:$0xff]   ;;  %v1065_v4 = vld [vmem:[#allocation7 + $0x10] sm:$0xff]   ;;  %s862_s0 = sshll.u32 %s1596_s12, 4  ;;  %p877_p13 = scmp.le.s32.totalorder %s1271_s21, 0 }
  0x9c   : > { %906 = vmatprep.subr.bf16.mxu1 %v1294_v0  ;;  %908 = vmatprep.mubr.msk.bf16.mxu1 %vm1295_vm0, %v1294_v0  ;;  %v872_v6 = vld [vmem:[%s1724_s3] ss:$0 sm:$0xff]  ;;  %s1629_s10 = scalar_lea.vmem [#allocation8], %s862_s0  ;;  %v1067_v33 = vld [vmem:[#allocation7 + $0x10] sm:$0xff] (!%p877_p13)   ;;  %v1296_v34 = vmov (!%p877_p13), 0.0   ;;  %v1068_v35 = vld [vmem:[#allocation7 + $0x18] sm:$0xff] (!%p877_p13)  }
  0x9d   : > { %901 = vmatpush3.bf16.msra.mxu0 %v1062_v1  ;;  %907 = vmatpush3.bf16.msra.mxu1 %v1064_v3  ;;  %vm1297_vm2 = vmmov (!%p877_p13), 0   ;;  %v574_v36 = vld [vmem:[%s291_s18] sm:$0xf] (!%p877_p13) }
  0x9e   : > { %912 = vmatprep.subr.bf16.mxu0 %v1294_v0  ;;  %918 = vmatprep.subr.bf16.mxu1 %v1294_v0 }
  0xa0   : > { %903 = vmatmul.mubr.msk.bf16.vlgmr.msra.gmra.mrb[0].mxu0 %vm353_vm1, %v1063_v2  ;;  %909 = vmatmul.mubr.msk.bf16.vlgmr.msra.gmra.mrb[0].mxu1 %vm353_vm1, %v1063_v2 }
  0xa1   : > { %913 = vmatpush3.bf16.msra.mxu0 %v1065_v4  ;;  %914 = vmatprep.mubr.msk.bf16.mxu0 %vm1295_vm0, %v1294_v0 }
  0xa2   : > { %919 = vmatpush3.bf16.msra.mxu1 %v1066_v5  ;;  %920 = vmatprep.mubr.msk.bf16.mxu1 %vm1295_vm0, %v1294_v0 }
  0xa3   : > { %924 = vmatprep.subr.bf16.mxu0 (!%p877_p13), %v1296_v34  ;;  %930 = vmatprep.subr.bf16.mxu1 (!%p877_p13), %v1296_v34 }
  0xa8   : > { %915 = vmatmul.mubr.msk.bf16.vlgmr.msra.gmra.mrb[4].mxu0 %vm353_vm1, %v1063_v2  ;;  %921 = vmatmul.mubr.msk.bf16.vlgmr.msra.gmra.mrb[4].mxu1 %vm353_vm1, %v1063_v2 }
  0xa9   : > { %925 = vmatpush3.bf16.msra.mxu0 (!%p877_p13), %v1067_v33  ;;  %926 = vmatprep.mubr.msk.bf16.mxu0 (!%p877_p13), %vm1297_vm2, %v1296_v34 }
  0xaa   : > { %931 = vmatpush3.bf16.msra.mxu1 (!%p877_p13), %v1068_v35  ;;  %932 = vmatprep.mubr.msk.bf16.mxu1 (!%p877_p13), %vm1297_vm2, %v1296_v34 }
 0x173   : > { %v391_v7 = vpop.f32.mrb[0].mxu0  ;;  %v441_v11 = vpop.f32.mrb[0].mxu1 }
 0x174   : > { %v553_v8 = vadd.f32 %v872_v6, %v391_v7  ;;  %v904_v9 = vpop.f32.mrb[1].mxu0  ;;  %v910_v14 = vpop.f32.mrb[1].mxu1 }
 0x175   : > { %v394_v10 = vpop.f32.mrb[2].mxu0  ;;  %v444_v15 = vpop.f32.mrb[2].mxu1 }
 0x176   : > { %555 = vst [vmem:[%s1629_s10] sm:$0xff] %v553_v8  ;;  %v554_v12 = vadd.f32 %v872_v6, %v394_v10  ;;  %v905_v13 = vpop.f32.mrb[3].mxu0  ;;  %v911_v16 = vpop.f32.mrb[3].mxu1  ;;  %927 = vmatmul.mubr.msk.bf16.vlgmr.msra.gmra.mrb[0].mxu0 (!%p877_p13), %vm353_vm1, %v574_v36  ;;  %933 = vmatmul.mubr.msk.bf16.vlgmr.msra.gmra.mrb[0].mxu1 (!%p877_p13), %vm353_vm1, %v574_v36 }
 0x178   : > { %556 = vst [vmem:[%s1629_s10 + $0x8] sm:$0xff] %v554_v12 }
 0x17b   : > { %v491_v17 = vpop.f32.mrb[4].mxu0  ;;  %v540_v21 = vpop.f32.mrb[4].mxu1 }
 0x17c   : > { %v916_v18 = vpop.f32.mrb[5].mxu0  ;;  %v922_v24 = vpop.f32.mrb[5].mxu1 }
 0x17d   : > { %v557_v19 = vld [vmem:[%s1629_s10 + $0x1] sm:$0x7f]  ;;  %v494_v20 = vpop.f32.mrb[6].mxu0  ;;  %v543_v26 = vpop.f32.mrb[6].mxu1 }
 0x17e   : > { %v559_v22 = vadd.f32 %v557_v19, %v441_v11  ;;  %v917_v23 = vpop.f32.mrb[7].mxu0  ;;  %v923_v28 = vpop.f32.mrb[7].mxu1 }
 0x17f   : > { %v558_v25 = vld [vmem:[%s1629_s10 + $0x9] sm:$0x7f] }
 0x180   : > { %561 = vst [vmem:[%s1629_s10 + $0x1] sm:$0x7f] %v559_v22  ;;  %v560_v27 = vadd.f32 %v558_v25, %v444_v15 }
 0x182   : > { %562 = vst [vmem:[%s1629_s10 + $0x9] sm:$0x7f] %v560_v27 }
 0x187   : > { %v674_v37 = vld [vmem:[%s1629_s10] sm:$0xff] (!%p877_p13) }
 0x189   : > { %v873_v29 = vld [vmem:[%s1629_s10 + $0x8] sm:$0xff] }
 0x18a   : > { %v565_v30 = vadd.f32 %v873_v29, %v491_v17 }
 0x18c   : > { %874 = vst [vmem:[%s1629_s10 + $0x8] sm:$0xff] %v565_v30 }
 0x190   : > { %573 = sbr.rel (%p877_p13) target bundleno = 599 (0x257), region = 52 }
 0x193   : > { %v875_v31 = vld [vmem:[%s1629_s10 + $0x9] sm:$0x7f] }
 0x194   : > { %v568_v32 = vadd.f32 %v875_v31, %v540_v21 }
 0x196   : > { %876 = vst [vmem:[%s1629_s10 + $0x9] sm:$0x7f] %v568_v32 }
 0x249   : > { %v620_v38 = vpop.f32.mrb[0].mxu0  ;;  %v668_v41 = vpop.f32.mrb[0].mxu1 }
 0x24a   : > { %v675_v39 = vadd.f32 %v674_v37, %v620_v38  ;;  %v928_v40 = vpop.f32.mrb[1].mxu0  ;;  %v934_v43 = vpop.f32.mrb[1].mxu1 }
 0x24b   : > { %v623_v42 = vpop.f32.mrb[2].mxu0  ;;  %v671_v45 = vpop.f32.mrb[2].mxu1 }
 0x24c   : > { %676 = vst [vmem:[%s1629_s10] sm:$0xff] %v675_v39  ;;  %v929_v44 = vpop.f32.mrb[3].mxu0  ;;  %v935_v46 = vpop.f32.mrb[3].mxu1 }
 0x253   : > { %v677_v47 = vld [vmem:[%s1629_s10 + $0x1] sm:$0x7f] }
 0x254   : > { %v678_v48 = vadd.f32 %v677_v47, %v668_v41 }
 0x256   : > { %679 = vst [vmem:[%s1629_s10 + $0x1] sm:$0x7f] %v678_v48 }
 0x257 PF: > { %s883_s8 = sshll.u32 %s1271_s21, 1  ;;  %s884_s29 = sshll.u32 %s1275_s22, 3 }
 0x258   : > { %s697_s15 = sshll.u32 %s1629_s10, 4  ;;  %s694_s2 = sadd.s32 %s884_s29, %s883_s8  ;;  %s1653_s15 = int_to_ptr.vmem [resolvable:$true] %s697_s15 }
 0x259   : > { %s885_s5 = sshll.u32 %s694_s2, 7  ;;  %s681_s6 = scalar_lea.sflag [#allocation4], %s1596_s12 }
 0x25a   : > { %s1658_s9 = scalar_lea.hbm %s1725_s4, %s885_s5  ;;  %s1157_s20 = scalar_lea.vmem %s1653_s15, 256 }
 0x25b   : > { %p1158_p6 = scmp.ne.s32.totalorder %s1653_s15, %s1157_s20  ;;  %p1777_p10 = scmp.ne.s32.totalorder %s1755_s7, 0 }
 0x25c   : > { %s1298_s21 = smov [#allocation8]  }
 0x25d   : > { %p1159_p3 = pnand %p1158_p6, %p1777_p10  ;;  %s1161_s22 = sshll.u32 %s1298_s21, 4  ;;  %s1162_s22 = int_to_ptr.vmem [resolvable:$false] %s1161_s22 }
 0x25e   : > { %s1163_s30 = scalar_lea.vmem %s1162_s22, 512  ;;  %p1164_p2 = scmp.lt.s32.totalorder %s1653_s15, %s1162_s22 }
 0x25f   : > { %p1160_p7 = pneg %p1159_p3  ;;  %p1165_p8 = scmp.lt.s32.totalorder %s1163_s30, %s1157_s20 }
 0x261   : > { %p1166_p1 = por %p1165_p8, %p1164_p2 }
 0x263   : > { %p1167_p12 = pnand %p1166_p1, %p1160_p7 }
 0x265   : > { %1170 = shalt.err (!%p1167_p12)
}
 0x266   : > { %s1171_s11 = scalar_lea.hbm %s1658_s9, 256  ;;  %s1175_s0 = scalar_lea.hbm %s1725_s4, 2048 }
 0x267   : > { %p1172_p0 = scmp.ne.s32.totalorder %s1658_s9, %s1171_s11  ;;  %p1176_p9 = scmp.lt.u32.totalorder %s1658_s9, %s1725_s4 }
 0x268   : > { %p1177_p5 = scmp.lt.u32.totalorder %s1175_s0, %s1171_s11  ;;  %p1179_p6 = scmp.lt.u32.totalorder %s1171_s11, %s1658_s9 }
 0x269   : > { %p1173_p11 = pnand %p1172_p0, %p1777_p10 }
 0x26a   : > { %p1178_p13 = por %p1177_p5, %p1176_p9 }
 0x26b   : > { %p1174_p4 = pneg %p1173_p11 }
 0x26c   : > { %p1180_p3 = por %p1179_p6, %p1178_p13 }
 0x26e   : > { %p1181_p7 = pnand %p1180_p3, %p1174_p4 }
 0x270   : > { %1184 = shalt.err (!%p1181_p7)
}
 0x271   : > { %s1299_s10 = smov 128   ;;  %s1300_s8 = smov 8  }
 0x272   : > { %944 = dma.vmem_to_hbm [thread:$0]  (%p1777_p10), %s1653_s15, 256, %s1658_s9, %s681_s6, %s1299_s10, %s1299_s10, %s1300_s8  }
 0x273 PF: > { %s1778_s29 = sld [smem:[#allocation13_spill]]  ;;  %s1779_s2 = sld [smem:[#allocation16_spill]] }
 0x274   : > { %p964_p2 = scmp.ge.s32.totalorder %s1287_s25, 2 }
 0x279   : > { %s712_s5 = sand.u32 1, %s1778_s29   ;;  %p1780_p8 = scmp.ne.s32.totalorder %s1779_s2, 0 }
 0x27a   : > { %s713_s14 = scalar_lea.sflag [#allocation4], %s712_s5 }
 0x27b   : > { %p958_p1 = pnand %p964_p2, %p1780_p8 }
 0x27d   : > { %1242 = dma.done.wait (!%p958_p1), %s713_s14, 256  }
 0x27e   : > { %1244 = vsyncadd (!%p958_p1), %s713_s14, 4294967040  ;;  %s23_s25 = sadd.s32 1, %s1287_s25   ;;  %s1781_s7 = sld [smem:[#allocation14_spill]] }
 0x27f   : > { %p20_p12 = scmp.ge.s32.totalorder %s23_s25, 10   ;;  %s1782_s20 = sld [smem:[#allocation19_spill]] }
 0x280   : > { %s1783_s21 = sld [smem:[#allocation15_spill]]  ;;  %s1784_s23 = sld [smem:[#allocation17_spill]] }
 0x281   : > { %s1785_s12 = sld [smem:[#allocation18_spill]]  ;;  %s1786_s15 = smov %s1251_s16 }
 0x282   : > { %s1787_s16 = smov %s1255_s17  ;;  %s1788_s17 = smov %s1549_s13 }
 0x283   : > { %s1789_s18 = smov %s1263_s19  ;;  %s1791_s22 = smov %s1283_s24 }
 0x284   : > { %s1790_s19 = smov %s1781_s7  ;;  %22 = sbr.rel (!%p20_p12) target bundleno = 14 (0xe), region = 110 }
 0x287   : > { %s1792_s24 = smov %s1785_s12 }
 0x28b   :  { %718 = vsyncpa [#allocation3], 1 }
 0x28c   :  { %720 = vsyncpa [#allocation3 + $0x1], 1 }
 0x28d   :  { %721 = vsyncpa [#allocation6], 1 }
 0x28e   :  { %723 = vsyncpa [#allocation6 + $0x1], 1 }
 0x28f   :  { %724 = vsyncpa [#allocation4], 1 }
 0x290   :  { %726 = vsyncpa [#allocation4 + $0x1], 1 }

</bundles_post_ra>
